<compile_context>
chip_gen: v7x
topology: tpu7x:2x2x1
jax: 0.10.0
libtpu: 0.0.40
codegen_flags: <defaults>
</compile_context>

<pallas_src>
import numpy as np
import jax
import jax.numpy as jnp
from jax import lax
from jax.experimental import pallas as pl
from jax.experimental.pallas import tpu as pltpu


# ---------------------------------------------------------------------------
# Separable 1-D interpolation weights (runs on the VPU inside the kernel)
# ---------------------------------------------------------------------------
def _axis_weights(start, bin_size, n_out, n_in, n_samples, order):
    """Sample-averaged 1-D interpolation weights for one spatial axis.

    Returns an (n_out, n_in) f32 matrix whose row `p` holds the averaged
    interpolation weight of every input coordinate for output bin `p`.
    `start` / `bin_size` are traced per-ROI f32 scalars.
    """
    col = lax.broadcasted_iota(jnp.int32, (n_out, n_in), 1).astype(jnp.float32)
    row = lax.broadcasted_iota(jnp.int32, (n_out, n_in), 0).astype(jnp.float32)
    base = start + row * bin_size                 # per-bin start coordinate
    sub = bin_size * (1.0 / n_samples)
    w = jnp.zeros((n_out, n_in), jnp.float32)
    for k in range(n_samples):                    # static, small unroll
        t = base + (k + 0.5) * sub                # sample coordinate
        valid = ((t >= -1.0) & (t <= float(n_in))).astype(jnp.float32)
        if order == 1:
            # Bilinear 1-D weight == hat function around the clamped sample
            # coordinate; reproduces the y_low/y_high border clamping of the
            # reference CUDA kernel with pure arithmetic (no compare/select
            # chains, no integer corner indices).
            tc = jnp.clip(t, 0.0, float(n_in - 1))
            w = w + valid * jnp.maximum(1.0 - jnp.abs(tc - col), 0.0)
        else:
            # Nearest neighbour.
            tn = jnp.minimum(jnp.floor(jnp.maximum(t, 0.0) + 0.5),
                             float(n_in - 1))
            w = w + valid * (col == tn).astype(jnp.float32)
    return w * jnp.float32(1.0 / n_samples)       # average over this axis' samples


# ---------------------------------------------------------------------------
# Pallas kernel: one grid step == one ROI
# ---------------------------------------------------------------------------
def _make_roi_align_2d_kernel(C, H, W, out_h, out_w, n_samples, spatial_scale,
                              order):
    def kernel(batch_ref, rois_ref, feat_ref, out_ref):
        # batch_ref : (num_rois,)        int32 SMEM (scalar prefetch; index_map only)
        # rois_ref  : (5, num_rois)      f32   SMEM (scalar prefetch)
        # feat_ref  : (1, C, H, W)       VMEM  feature block of this ROI's image
        # out_ref   : (1, C, out_h, out_w) VMEM output block of this ROI
        del batch_ref  # only used by the index_map
        r = pl.program_id(0)
        scale = jnp.float32(spatial_scale)

        x1 = rois_ref[1, r] * scale
        y1 = rois_ref[2, r] * scale
        x2 = rois_ref[3, r] * scale
        y2 = rois_ref[4, r] * scale

        roi_w = jnp.maximum(x2 - x1, jnp.float32(1.0))
        roi_h = jnp.maximum(y2 - y1, jnp.float32(1.0))
        bin_h = roi_h * (1.0 / out_h)
        bin_w = roi_w * (1.0 / out_w)

        # Tiny separable weight factors (a few thousand VPU elements total,
        # versus ~sr^2 * 12 full passes over OHW*H*W in the previous version).
        wy = _axis_weights(y1, bin_h, out_h, H, n_samples, order)   # (out_h, H)
        wx = _axis_weights(x1, bin_w, out_w, W, n_samples, order)   # (out_w, W)

        f3 = feat_ref[0]                          # (C, H, W), feature dtype
        dt = f3.dtype

        # Matmul operands stay in the feature dtype (bf16 end-to-end for bf16
        # inputs); accumulate in f32 via preferred_element_type. No HIGHEST.
        wyb = jnp.broadcast_to(wy.astype(dt)[None], (C, out_h, H))
        # (C, out_h, H) x (C, H, W) -> (C, out_h, W), batched over channels.
        t1 = lax.dot_general(
            wyb, f3,
            dimension_numbers=(((2,), (1,)), ((0,), (0,))),
            preferred_element_type=jnp.float32)

        wxb = jnp.broadcast_to(wx.astype(dt)[None], (C, out_w, W))
        # (C, out_h, W) x (C, out_w, W) -> (C, out_h, out_w), contract W.
        o = lax.dot_general(
            t1.astype(dt), wxb,
            dimension_numbers=(((2,), (2,)), ((0,), (0,))),
            preferred_element_type=jnp.float32)

        out_ref[0] = o.astype(out_ref.dtype)

    return kernel


def roi_align_2d(features, rois, output_size, spatial_scale, sampling_ratio,
                 order=1):
    """features: (N, C, H, W); rois: (n, 5) = (batch_idx, x1, y1, x2, y2)."""
    assert order in (0, 1)
    if sampling_ratio <= 0:
        # TODO(synk): adaptive sampling grid (ceil(roi_size/out_size) per ROI)
        # needs data-dependent loop bounds; only sampling_ratio > 0 is supported.
        raise NotImplementedError("sampling_ratio must be > 0 for the Pallas kernel")
    out_h, out_w = output_size
    N, C, H, W = features.shape
    num_rois = rois.shape[0]

    rois_f = rois.astype(jnp.float32)
    # Clamp the batch index so a malformed ROI can never cause an OOB block DMA.
    batch_idx = jnp.clip(rois_f[:, 0].astype(jnp.int32), 0, N - 1)

    # Sort ROIs by batch index: consecutive grid steps then reuse the same
    # feature block index and Pallas skips the HBM->VMEM re-DMA of the image.
    perm = jnp.argsort(batch_idx)
    inv_perm = jnp.argsort(perm)
    batch_sorted = batch_idx[perm]
    rois_t = rois_f[perm].T                       # (5, num_rois): SMEM-friendly

    kernel = _make_roi_align_2d_kernel(C, H, W, out_h, out_w,
                                       int(sampling_ratio),
                                       float(spatial_scale), int(order))

    out = pl.pallas_call(
        kernel,
        out_shape=jax.ShapeDtypeStruct((num_rois, C, out_h, out_w),
                                       features.dtype),
        grid_spec=pltpu.PrefetchScalarGridSpec(
            num_scalar_prefetch=2,                # batch_idx, rois -> SMEM
            grid=(num_rois,),
            in_specs=[
                # Native NCHW: no wrapper-side transpose of the feature map.
                pl.BlockSpec((1, C, H, W),
                             lambda r, bidx, rr: (bidx[r], 0, 0, 0)),
            ],
            out_specs=pl.BlockSpec((1, C, out_h, out_w),
                                   lambda r, bidx, rr: (r, 0, 0, 0)),
        ),
        compiler_params=pltpu.CompilerParams(
            # Independent ROIs, disjoint output blocks -> parallel (lets v7x
            # shard the ROI axis across its two TensorCores).
            dimension_semantics=("parallel",),
            # Default scoped VMEM limit (16/32 MiB on v5e/v6e) is too small for
            # realistic whole-image feature blocks; raise it explicitly.
            vmem_limit_bytes=100 * 1024 * 1024,
        ),
    )(batch_sorted, rois_t, features)

    # Undo the batch-index sort; output is already in PyTorch NCHW layout.
    return out[inv_perm]


class RoIAlign:
    """JAX/Pallas mirror of the PyTorch RoIAlign module (2D path)."""

    def __init__(self, output_size, spatial_scale, sampling_ratio=-1):
        self.output_size = tuple(output_size)
        self.spatial_scale = float(spatial_scale)
        self.sampling_ratio = int(sampling_ratio)
        self.dim = len(self.output_size)
        if self.dim not in (2, 3):
            raise Exception("Tried to init RoIAlign with incorrect output size")

    def __call__(self, features, rois, order=1):
        assert order in (0, 1), "only support order = 0 (nearest) or 1 (linear)"
        sampling_ratio = 1 if order == 0 else self.sampling_ratio
        if self.dim == 2:
            return roi_align_2d(features, rois, self.output_size,
                                self.spatial_scale, sampling_ratio, order)
        # TODO(synk): 3D (D,H,W) trilinear RoIAlign path not implemented.
        raise NotImplementedError("3D RoIAlign not implemented in this script")


# ---------------------------------------------------------------------------
# Pure-numpy reference (same formulas) for correctness checking
# ---------------------------------------------------------------------------
def _interp_ref(fb, y, x, order):
    C, H, W = fb.shape
    if y < -1.0 or y > H or x < -1.0 or x > W:
        return np.zeros((C,), np.float32)
    y = max(y, 0.0)
    x = max(x, 0.0)
    if order == 1:
        y0, x0 = int(y), int(x)
        if y0 >= H - 1:
            y_low = y_high = H - 1
            y = float(y_low)
        else:
            y_low, y_high = y0, y0 + 1
        if x0 >= W - 1:
            x_low = x_high = W - 1
            x = float(x_low)
        else:
            x_low, x_high = x0, x0 + 1
        ly, lx = y - y_low, x - x_low
        hy, hx = 1.0 - ly, 1.0 - lx
        return (hy * hx * fb[:, y_low, x_low] + hy * lx * fb[:, y_low, x_high] +
                ly * hx * fb[:, y_high, x_low] + ly * lx * fb[:, y_high, x_high])
    yn = min(int(y + 0.5), H - 1)
    xn = min(int(x + 0.5), W - 1)
    return fb[:, yn, xn]


def roi_align_2d_ref(features, rois, output_size, spatial_scale,
                     sampling_ratio, order):
    f = np.asarray(features, np.float32)
    r = np.asarray(rois, np.float32)
    N, C, H, W = f.shape
    out_h, out_w = output_size
    nr = r.shape[0]
    out = np.zeros((nr, C, out_h, out_w), np.float32)
    for i in range(nr):
        b = int(r[i, 0])
        sw, sh = r[i, 1] * spatial_scale, r[i, 2] * spatial_scale
        ew, eh = r[i, 3] * spatial_scale, r[i, 4] * spatial_scale
        rw, rh = max(ew - sw, 1.0), max(eh - sh, 1.0)
        bh, bw = rh / out_h, rw / out_w
        gh = gw = sampling_ratio
        cnt = gh * gw
        for ph in range(out_h):
            for pw in range(out_w):
                acc = np.zeros((C,), np.float32)
                for iy in range(gh):
                    y = sh + ph * bh + (iy + 0.5) * bh / gh
                    for ix in range(gw):
                        x = sw + pw * bw + (ix + 0.5) * bw / gw
                        acc = acc + _interp_ref(f[b], y, x, order)
                out[i, :, ph, pw] = acc / cnt
    return out


# ---------------------------------------------------------------------------
if __name__ == "__main__":
    key = jax.random.PRNGKey(0)
    N, C, H, W = 2, 4, 16, 16
    features = jax.random.normal(key, (N, C, H, W), dtype=jnp.float32)

    # (batch_idx, x1, y1, x2, y2) in "image" coords; spatial_scale maps to the
    # 16x16 feature map.  Last ROI spills slightly past the border to exercise
    # the clamp / out-of-range path.  Batch indices are deliberately unsorted
    # to exercise the sort/unsort path in the wrapper.
    rois = jnp.array([
        [0.0,  2.0,  3.0, 20.0, 24.0],
        [1.0,  0.0,  0.0, 30.0, 30.0],
        [0.0,  8.0,  6.0, 33.0, 18.0],
    ], dtype=jnp.float32)

    module = RoIAlign(output_size=(4, 4), spatial_scale=0.5, sampling_ratio=2)

    # Tolerance note: matmuls now run at default MXU precision with operands in
    # the feature dtype (per the perf review), i.e. single-pass bf16 rounding of
    # the operands (rel ~2^-9).  For O(1) Gaussian features that bounds the
    # error at ~1e-2; genuine indexing/weight bugs would show up as O(0.1-1).
    TOL = 3e-2

    # order = 1 (bilinear), f32 features
    out1 = jax.block_until_ready(module(features, rois, order=1))
    ref1 = roi_align_2d_ref(np.asarray(features), np.asarray(rois),
                            (4, 4), 0.5, 2, 1)
    assert out1.shape == (3, C, 4, 4)
    np.testing.assert_allclose(np.asarray(out1), ref1, rtol=TOL, atol=TOL)

    # order = 0 (nearest; sampling_ratio forced to 1 as in the PyTorch module)
    out0 = jax.block_until_ready(module(features, rois, order=0))
    ref0 = roi_align_2d_ref(np.asarray(features), np.asarray(rois),
                            (4, 4), 0.5, 1, 0)
    np.testing.assert_allclose(np.asarray(out0), ref0, rtol=TOL, atol=TOL)

    # bf16 end-to-end path (operands, feature block and output all bf16).
    feat_bf16 = features.astype(jnp.bfloat16)
    out1b = jax.block_until_ready(module(feat_bf16, rois, order=1))
    ref1b = roi_align_2d_ref(np.asarray(feat_bf16.astype(jnp.float32)),
                             np.asarray(rois), (4, 4), 0.5, 2, 1)
    assert out1b.dtype == jnp.bfloat16
    np.testing.assert_allclose(np.asarray(out1b.astype(jnp.float32)), ref1b,
                               rtol=4e-2, atol=4e-2)

    print("KERNEL_OK")
</pallas_src>

<mosaic_0001>
module attributes {stable_mosaic.version = 11 : i64} {
  func.func @kernel(%arg0: i32, %arg1: memref<3xi32, #tpu.memory_space<smem>>, %arg2: memref<5x3xf32, #tpu.memory_space<smem>>, %arg3: memref<1x4x16x16xf32, #tpu.memory_space<vmem>>, %arg4: memref<1x4x4x4xf32, #tpu.memory_space<vmem>>) attributes {dimension_semantics = [#tpu.dimension_semantics<parallel>], iteration_bounds = array<i64: 3>, scalar_prefetch = 2 : i64, scratch_operands = 0 : i64, tpu.core_type = #tpu.core_type<tc>, window_params = [{transform_indices = @transform_0, window_bounds = array<i64: 1, 4, 16, 16>}, {transform_indices = @transform_1, window_bounds = array<i64: 1, 4, 4, 4>}]} {
    %c1 = arith.constant 1 : index
    %0 = arith.index_cast %arg0 : i32 to index
    %1 = memref.load %arg2[%c1, %0] : memref<5x3xf32, #tpu.memory_space<smem>>
    %cst = arith.constant 5.000000e-01 : f32
    %2 = arith.mulf %1, %cst : f32
    %c2 = arith.constant 2 : index
    %3 = arith.index_cast %arg0 : i32 to index
    %4 = memref.load %arg2[%c2, %3] : memref<5x3xf32, #tpu.memory_space<smem>>
    %cst_0 = arith.constant 5.000000e-01 : f32
    %5 = arith.mulf %4, %cst_0 : f32
    %c3 = arith.constant 3 : index
    %6 = arith.index_cast %arg0 : i32 to index
    %7 = memref.load %arg2[%c3, %6] : memref<5x3xf32, #tpu.memory_space<smem>>
    %cst_1 = arith.constant 5.000000e-01 : f32
    %8 = arith.mulf %7, %cst_1 : f32
    %c4 = arith.constant 4 : index
    %9 = arith.index_cast %arg0 : i32 to index
    %10 = memref.load %arg2[%c4, %9] : memref<5x3xf32, #tpu.memory_space<smem>>
    %cst_2 = arith.constant 5.000000e-01 : f32
    %11 = arith.mulf %10, %cst_2 : f32
    %12 = arith.subf %8, %2 : f32
    %cst_3 = arith.constant 1.000000e+00 : f32
    %13 = arith.maximumf %12, %cst_3 : f32
    %14 = arith.subf %11, %5 : f32
    %cst_4 = arith.constant 1.000000e+00 : f32
    %15 = arith.maximumf %14, %cst_4 : f32
    %cst_5 = arith.constant 2.500000e-01 : f32
    %16 = arith.mulf %15, %cst_5 : f32
    %cst_6 = arith.constant 2.500000e-01 : f32
    %17 = arith.mulf %13, %cst_6 : f32
    %18 = tpu.iota {dimensions = array<i32: 1>} : vector<4x16xi32>
    %19 = arith.sitofp %18 : vector<4x16xi32> to vector<4x16xf32>
    %20 = tpu.iota {dimensions = array<i32: 0>} : vector<4x16xi32>
    %21 = arith.sitofp %20 : vector<4x16xi32> to vector<4x16xf32>
    %22 = vector.broadcast %16 : f32 to vector<4x16xf32>
    %23 = arith.mulf %21, %22 : vector<4x16xf32>
    %24 = vector.broadcast %5 : f32 to vector<4x16xf32>
    %25 = arith.addf %24, %23 : vector<4x16xf32>
    %cst_7 = arith.constant 5.000000e-01 : f32
    %26 = arith.mulf %16, %cst_7 : f32
    %cst_8 = arith.constant 0.000000e+00 : f32
    %27 = vector.broadcast %cst_8 : f32 to vector<4x16xf32>
    %cst_9 = arith.constant 5.000000e-01 : f32
    %28 = arith.mulf %cst_9, %26 : f32
    %29 = vector.broadcast %28 : f32 to vector<4x16xf32>
    %30 = arith.addf %25, %29 : vector<4x16xf32>
    %cst_10 = arith.constant -1.000000e+00 : f32
    %31 = vector.broadcast %cst_10 : f32 to vector<4x16xf32>
    %32 = arith.cmpf oge, %30, %31 : vector<4x16xf32>
    %cst_11 = arith.constant 1.600000e+01 : f32
    %33 = vector.broadcast %cst_11 : f32 to vector<4x16xf32>
    %34 = arith.cmpf ole, %30, %33 : vector<4x16xf32>
    %35 = arith.andi %32, %34 : vector<4x16xi1>
    %36 = arith.extui %35 : vector<4x16xi1> to vector<4x16xi32>
    %37 = arith.sitofp %36 : vector<4x16xi32> to vector<4x16xf32>
    %cst_12 = arith.constant 0.000000e+00 : f32
    %cst_13 = arith.constant 1.500000e+01 : f32
    %38 = vector.broadcast %cst_12 : f32 to vector<4x16xf32>
    %39 = arith.maximumf %38, %30 : vector<4x16xf32>
    %40 = vector.broadcast %cst_13 : f32 to vector<4x16xf32>
    %41 = arith.minimumf %40, %39 : vector<4x16xf32>
    %42 = arith.subf %41, %19 : vector<4x16xf32>
    %43 = math.absf %42 : vector<4x16xf32>
    %cst_14 = arith.constant 1.000000e+00 : f32
    %44 = vector.broadcast %cst_14 : f32 to vector<4x16xf32>
    %45 = arith.subf %44, %43 : vector<4x16xf32>
    %cst_15 = arith.constant 0.000000e+00 : f32
    %46 = vector.broadcast %cst_15 : f32 to vector<4x16xf32>
    %47 = arith.maximumf %45, %46 : vector<4x16xf32>
    %48 = arith.mulf %37, %47 : vector<4x16xf32>
    %49 = arith.addf %27, %48 : vector<4x16xf32>
    %cst_16 = arith.constant 1.500000e+00 : f32
    %50 = arith.mulf %cst_16, %26 : f32
    %51 = vector.broadcast %50 : f32 to vector<4x16xf32>
    %52 = arith.addf %25, %51 : vector<4x16xf32>
    %cst_17 = arith.constant -1.000000e+00 : f32
    %53 = vector.broadcast %cst_17 : f32 to vector<4x16xf32>
    %54 = arith.cmpf oge, %52, %53 : vector<4x16xf32>
    %cst_18 = arith.constant 1.600000e+01 : f32
    %55 = vector.broadcast %cst_18 : f32 to vector<4x16xf32>
    %56 = arith.cmpf ole, %52, %55 : vector<4x16xf32>
    %57 = arith.andi %54, %56 : vector<4x16xi1>
    %58 = arith.extui %57 : vector<4x16xi1> to vector<4x16xi32>
    %59 = arith.sitofp %58 : vector<4x16xi32> to vector<4x16xf32>
    %cst_19 = arith.constant 0.000000e+00 : f32
    %cst_20 = arith.constant 1.500000e+01 : f32
    %60 = vector.broadcast %cst_19 : f32 to vector<4x16xf32>
    %61 = arith.maximumf %60, %52 : vector<4x16xf32>
    %62 = vector.broadcast %cst_20 : f32 to vector<4x16xf32>
    %63 = arith.minimumf %62, %61 : vector<4x16xf32>
    %64 = arith.subf %63, %19 : vector<4x16xf32>
    %65 = math.absf %64 : vector<4x16xf32>
    %cst_21 = arith.constant 1.000000e+00 : f32
    %66 = vector.broadcast %cst_21 : f32 to vector<4x16xf32>
    %67 = arith.subf %66, %65 : vector<4x16xf32>
    %cst_22 = arith.constant 0.000000e+00 : f32
    %68 = vector.broadcast %cst_22 : f32 to vector<4x16xf32>
    %69 = arith.maximumf %67, %68 : vector<4x16xf32>
    %70 = arith.mulf %59, %69 : vector<4x16xf32>
    %71 = arith.addf %49, %70 : vector<4x16xf32>
    %cst_23 = arith.constant 5.000000e-01 : f32
    %72 = vector.broadcast %cst_23 : f32 to vector<4x16xf32>
    %73 = arith.mulf %71, %72 : vector<4x16xf32>
    %74 = tpu.iota {dimensions = array<i32: 1>} : vector<4x16xi32>
    %75 = arith.sitofp %74 : vector<4x16xi32> to vector<4x16xf32>
    %76 = tpu.iota {dimensions = array<i32: 0>} : vector<4x16xi32>
    %77 = arith.sitofp %76 : vector<4x16xi32> to vector<4x16xf32>
    %78 = vector.broadcast %17 : f32 to vector<4x16xf32>
    %79 = arith.mulf %77, %78 : vector<4x16xf32>
    %80 = vector.broadcast %2 : f32 to vector<4x16xf32>
    %81 = arith.addf %80, %79 : vector<4x16xf32>
    %cst_24 = arith.constant 5.000000e-01 : f32
    %82 = arith.mulf %17, %cst_24 : f32
    %cst_25 = arith.constant 0.000000e+00 : f32
    %83 = vector.broadcast %cst_25 : f32 to vector<4x16xf32>
    %cst_26 = arith.constant 5.000000e-01 : f32
    %84 = arith.mulf %cst_26, %82 : f32
    %85 = vector.broadcast %84 : f32 to vector<4x16xf32>
    %86 = arith.addf %81, %85 : vector<4x16xf32>
    %cst_27 = arith.constant -1.000000e+00 : f32
    %87 = vector.broadcast %cst_27 : f32 to vector<4x16xf32>
    %88 = arith.cmpf oge, %86, %87 : vector<4x16xf32>
    %cst_28 = arith.constant 1.600000e+01 : f32
    %89 = vector.broadcast %cst_28 : f32 to vector<4x16xf32>
    %90 = arith.cmpf ole, %86, %89 : vector<4x16xf32>
    %91 = arith.andi %88, %90 : vector<4x16xi1>
    %92 = arith.extui %91 : vector<4x16xi1> to vector<4x16xi32>
    %93 = arith.sitofp %92 : vector<4x16xi32> to vector<4x16xf32>
    %cst_29 = arith.constant 0.000000e+00 : f32
    %cst_30 = arith.constant 1.500000e+01 : f32
    %94 = vector.broadcast %cst_29 : f32 to vector<4x16xf32>
    %95 = arith.maximumf %94, %86 : vector<4x16xf32>
    %96 = vector.broadcast %cst_30 : f32 to vector<4x16xf32>
    %97 = arith.minimumf %96, %95 : vector<4x16xf32>
    %98 = arith.subf %97, %75 : vector<4x16xf32>
    %99 = math.absf %98 : vector<4x16xf32>
    %cst_31 = arith.constant 1.000000e+00 : f32
    %100 = vector.broadcast %cst_31 : f32 to vector<4x16xf32>
    %101 = arith.subf %100, %99 : vector<4x16xf32>
    %cst_32 = arith.constant 0.000000e+00 : f32
    %102 = vector.broadcast %cst_32 : f32 to vector<4x16xf32>
    %103 = arith.maximumf %101, %102 : vector<4x16xf32>
    %104 = arith.mulf %93, %103 : vector<4x16xf32>
    %105 = arith.addf %83, %104 : vector<4x16xf32>
    %cst_33 = arith.constant 1.500000e+00 : f32
    %106 = arith.mulf %cst_33, %82 : f32
    %107 = vector.broadcast %106 : f32 to vector<4x16xf32>
    %108 = arith.addf %81, %107 : vector<4x16xf32>
    %cst_34 = arith.constant -1.000000e+00 : f32
    %109 = vector.broadcast %cst_34 : f32 to vector<4x16xf32>
    %110 = arith.cmpf oge, %108, %109 : vector<4x16xf32>
    %cst_35 = arith.constant 1.600000e+01 : f32
    %111 = vector.broadcast %cst_35 : f32 to vector<4x16xf32>
    %112 = arith.cmpf ole, %108, %111 : vector<4x16xf32>
    %113 = arith.andi %110, %112 : vector<4x16xi1>
    %114 = arith.extui %113 : vector<4x16xi1> to vector<4x16xi32>
    %115 = arith.sitofp %114 : vector<4x16xi32> to vector<4x16xf32>
    %cst_36 = arith.constant 0.000000e+00 : f32
    %cst_37 = arith.constant 1.500000e+01 : f32
    %116 = vector.broadcast %cst_36 : f32 to vector<4x16xf32>
    %117 = arith.maximumf %116, %108 : vector<4x16xf32>
    %118 = vector.broadcast %cst_37 : f32 to vector<4x16xf32>
    %119 = arith.minimumf %118, %117 : vector<4x16xf32>
    %120 = arith.subf %119, %75 : vector<4x16xf32>
    %121 = math.absf %120 : vector<4x16xf32>
    %cst_38 = arith.constant 1.000000e+00 : f32
    %122 = vector.broadcast %cst_38 : f32 to vector<4x16xf32>
    %123 = arith.subf %122, %121 : vector<4x16xf32>
    %cst_39 = arith.constant 0.000000e+00 : f32
    %124 = vector.broadcast %cst_39 : f32 to vector<4x16xf32>
    %125 = arith.maximumf %123, %124 : vector<4x16xf32>
    %126 = arith.mulf %115, %125 : vector<4x16xf32>
    %127 = arith.addf %105, %126 : vector<4x16xf32>
    %cst_40 = arith.constant 5.000000e-01 : f32
    %128 = vector.broadcast %cst_40 : f32 to vector<4x16xf32>
    %129 = arith.mulf %127, %128 : vector<4x16xf32>
    %c0 = arith.constant 0 : index
    %c0_41 = arith.constant 0 : index
    %c0_42 = arith.constant 0 : index
    %c0_43 = arith.constant 0 : index
    %130 = vector.load %arg3[%c0, %c0_41, %c0_42, %c0_43] : memref<1x4x16x16xf32, #tpu.memory_space<vmem>>, vector<1x4x16x16xf32>
    %131 = vector.shape_cast %130 : vector<1x4x16x16xf32> to vector<4x16x16xf32>
    %132 = vector.shape_cast %73 : vector<4x16xf32> to vector<1x4x16xf32>
    %133 = vector.shape_cast %132 : vector<1x4x16xf32> to vector<1x4x16xf32>
    %134 = vector.broadcast %133 : vector<1x4x16xf32> to vector<4x4x16xf32>
    %cst_44 = arith.constant dense<0.000000e+00> : vector<4x4x16xf32>
    %135 = tpu.matmul %134, %131, %cst_44 {dimension_numbers = #tpu.dot_dimension_numbers<[2], [1], [1], [2], [0, 0, 0, 1, 1, 2], [0], [0]>} : vector<4x4x16xf32>, vector<4x16x16xf32>, vector<4x4x16xf32> -> vector<4x4x16xf32>
    %136 = vector.shape_cast %129 : vector<4x16xf32> to vector<1x4x16xf32>
    %137 = vector.shape_cast %136 : vector<1x4x16xf32> to vector<1x4x16xf32>
    %138 = vector.broadcast %137 : vector<1x4x16xf32> to vector<4x4x16xf32>
    %cst_45 = arith.constant dense<0.000000e+00> : vector<4x4x4xf32>
    %139 = tpu.matmul %135, %138, %cst_45 {dimension_numbers = #tpu.dot_dimension_numbers<[2], [2], [1], [1], [0, 0, 0, 1, 1, 1], [0], [0]>} : vector<4x4x16xf32>, vector<4x4x16xf32>, vector<4x4x4xf32> -> vector<4x4x4xf32>
    %c0_46 = arith.constant 0 : index
    %c0_47 = arith.constant 0 : index
    %c0_48 = arith.constant 0 : index
    %c0_49 = arith.constant 0 : index
    %140 = vector.load %arg4[%c0_46, %c0_47, %c0_48, %c0_49] : memref<1x4x4x4xf32, #tpu.memory_space<vmem>>, vector<1x4x4x4xf32>
    %141 = vector.shape_cast %140 : vector<1x4x4x4xf32> to vector<4x4x4xf32>
    %142 = vector.shape_cast %139 : vector<4x4x4xf32> to vector<1x4x4x4xf32>
    tpu.vector_store %arg4[%c0_46, %c0_47, %c0_48, %c0_49], %142 {strides = array<i32>} : memref<1x4x4x4xf32, #tpu.memory_space<vmem>>, vector<1x4x4x4xf32>,
    return
  }
  func.func @transform_0(%arg0: i32, %arg1: memref<3xi32, #tpu.memory_space<smem>>, %arg2: memref<5x3xf32, #tpu.memory_space<smem>>) -> (i32, i32, i32, i32) {
    %0 = arith.index_cast %arg0 : i32 to index
    %1 = memref.load %arg1[%0] : memref<3xi32, #tpu.memory_space<smem>>
    %c0_i32 = arith.constant 0 : i32
    %c0_i32_0 = arith.constant 0 : i32
    %c0_i32_1 = arith.constant 0 : i32
    %c0_i32_2 = arith.constant 0 : i32
    return %1, %c0_i32, %c0_i32_0, %c0_i32_1 : i32, i32, i32, i32
  }
  func.func @transform_1(%arg0: i32, %arg1: memref<3xi32, #tpu.memory_space<smem>>, %arg2: memref<5x3xf32, #tpu.memory_space<smem>>) -> (i32, i32, i32, i32) {
    %c0_i32 = arith.constant 0 : i32
    %c0_i32_0 = arith.constant 0 : i32
    %c0_i32_1 = arith.constant 0 : i32
    %c0_i32_2 = arith.constant 0 : i32
    return %arg0, %c0_i32, %c0_i32_0, %c0_i32_1 : i32, i32, i32, i32
  }
}

</mosaic_0001>

<bundles_post_ra>
// kernel: tpu_custom_call.1
= control target key start
LH: loop header
LB: loop body
LE: loop exit
PB: predicated region body
PF: predicated region fallthrough
CT: control target
= control target key end

     0   :  { %s1598_s0 = inlined_call_operand.hbm [shape: s32[3], index: 0, kind: input, shape index: {}]   ;;  %s1599_s2 = inlined_call_operand.hbm [shape: f32[2,4,16,16], index: 2, kind: input, shape index: {}]   ;;  %s1600_s3 = inlined_call_operand.hbm [shape: f32[3,4,4,4], index: 3, kind: output, shape index: {}]   ;;  %s1601_s1 = inlined_call_operand.hbm [shape: f32[5,3], index: 1, kind: input, shape index: {}]  }
   0x1   :  { %1604 = sst [smem:[#allocation14_spill]] %s1599_s2  ;;  %s1146_s14 = scalar_lea.hbm %s1598_s0, 16 }
   0x2   :  { %p1147_p0 = scmp.ne.s32.totalorder %s1598_s0, %s1146_s14  ;;  %p1150_p1 = scmp.lt.u32.totalorder %s1146_s14, %s1598_s0 }
   0x4   :  { %p1152_p2 = pnand %p1150_p1, %p1147_p0 }
   0x6   :  { %1155 = shalt.err (!%p1152_p2)  }
   0x7   :  { %s1290_s19 = smov [#allocation3]   ;;  %s1156_s24 = scalar_lea.hbm %s1601_s1, 128 }
   0x8   :  { %9 = dma.hbm_to_smem %s1598_s0, 16, %s1290_s19, [#allocation2] }
   0x9   :  { %p1157_p3 = scmp.ne.s32.totalorder %s1601_s1, %s1156_s24  ;;  %p1160_p4 = scmp.lt.u32.totalorder %s1156_s24, %s1601_s1 }
   0xb   :  { %p1162_p5 = pnand %p1160_p4, %p1157_p3 }
   0xd   :  { %1165 = shalt.err (!%p1162_p5)  }
   0xe   :  { %s1291_s29 = smov [#allocation4]  }
   0xf   :  { %11 = dma.hbm_to_smem %s1601_s1, 128, %s1291_s29, [#allocation2] }
  0x10   :  { %1252 = dma.done.wait [#allocation2], 144 }
  0x11   :  { %1253 = vsyncadd [#allocation2], 4294967152 }
  0x12   :  { %13 = sfence }
  0x13   :  { %14 = vsyncpa [#allocation6], 0 }
  0x14   :  { %16 = vsyncpa [#allocation6 + $0x1], 0 }
  0x15   :  { %17 = vsyncpa [#allocation7], 0 }
  0x16   :  { %19 = vsyncpa [#allocation7 + $0x1], 0  ;;  %s1346_s0 = smov 0   ;;  %s1348_s5 = smov 0  }
  0x17   :  { %s1350_s6 = smov 0   ;;  %s1352_s7 = smov 0  }
  0x18   :  { %s1354_s8 = smov 0   ;;  %s1356_s9 = smov 0  }
  0x19   :  { %s1358_s1 = smov 0  }
  0x1a LB: > { %s1380_s10 = sadd.s32 4294967295, %s1288_s1   ;;  %s938_s11 = sadd.s32 4294967294, %s1288_s1   ;;  %s1288_s1 = sphi %s1358_s1, %s1621_s1   ;;  %s1284_s9 = sphi %s1356_s9, %s1620_s9   ;;  %s1280_s8 = sphi %s1354_s8, %s1619_s8   ;;  %s1276_s7 = sphi %s1352_s7, %s1618_s7   ;;  %s1272_s6 = sphi %s1350_s6, %s1617_s6   ;;  %s1268_s5 = sphi %s1348_s5, %s1616_s5   ;;  %s1264_s0 = sphi %s1346_s0, %s1615_s0  }
  0x1b   : > { %s1384_s12 = sadd.s32 1, %s1288_s1   ;;  %s29_s13 = sld [smem:[#allocation3 + %s1288_s1]] }
  0x1c   : > { %s30_s14 = sld [smem:[#allocation3 + %s1384_s12]]  ;;  %s34_s15 = sadd.s32 1, %s1284_s9 }
  0x1d   : > { %p41_p6 = scmp.ne.s32.totalorder %s1284_s9, %s1280_s8  ;;  %p42_p7 = scmp.eq.s32.totalorder %s1288_s1, 0 }
  0x1e   : > { %p47_p8 = scmp.ne.s32.totalorder %s1280_s8, %s1276_s7  ;;  %p48_p9 = scmp.eq.s32.totalorder %s1380_s10, 0 }
  0x1f   : > { %p1394_p10 = por %p42_p7, %p41_p6  ;;  %s57_s17 = ssub.s32 %s1288_s1, %s1384_s12 }
  0x20   : > { %p1400_p11 = por %p48_p9, %p47_p8  ;;  %p58_p12 = scmp.eq.s32.totalorder %s57_s17, 0 }
  0x21   : > { %s60_s19 = sadd.s32 1, %s1272_s6  ;;  %p70_p13 = scmp.ne.s32.totalorder %s1272_s6, %s1268_s5 }
  0x22   : > { %s1606_s18 = scalar_select %p1400_p11, 1, 0 }
  0x23   : > { %s31_s20 = ssub.s32 %s29_s13, %s30_s14  ;;  %p71_p0 = scmp.eq.s32.totalorder %s1380_s10, 2 }
  0x24   : > { %p32_p1 = scmp.eq.s32.totalorder %s31_s20, 0  ;;  %p76_p2 = scmp.ne.s32.totalorder %s1268_s5, %s1264_s0 }
  0x25   : > { %s1411_s21 = scalar_select %p58_p12, %s1272_s6, %s60_s19  }
  0x26   : > { %s1414_s22 = scalar_select %p32_p1, %s1284_s9, %s34_s15  }
  0x27   : > { %p1416_p3 = por %p71_p0, %p70_p13  ;;  %p77_p4 = scmp.eq.s32.totalorder %s938_s11, 2 }
  0x28   : > { %p1078_p5 = scmp.lt.s32.totalorder %s1288_s1, 3  ;;  %s97_s25 = sand.u32 1, %s1284_s9  }
  0x29   : > { %s1607_s23 = scalar_select %p1416_p3, 1, 0 }
  0x2a   : > { %p1421_p6 = por %p77_p4, %p76_p2  ;;  %s941_s26 = sshll.u32 %s97_s25, 6 }
  0x2b   : > { %p1428_p7 = pnand %p1078_p5, %p1394_p10  ;;  %s101_s4 = scalar_lea.vmem [#allocation5], %s941_s26 }
  0x2c   : > { %s1608_s24 = scalar_select %p1421_p6, 1, 0 }
  0x2d   : > { %s1062_s28 = scalar_select %p1394_p10, [#allocation3], [#allocation9] }
  0x2e   : > { %s1063_s29 = scalar_select %p1394_p10, %s1288_s1, 0 }
  0x2f   : > { %s1623_s28 = smov (!%p1078_p5, %s1062_s28), [#allocation10]  ;;  %s109_s7 = sshll.u32 %s101_s4, 4  ;;  %s1439_s7 = int_to_ptr.vmem [resolvable:$true] %s109_s7 }
  0x30   : > { %s1625_s29 = smov (!%p1078_p5, %s1063_s29), 0  ;;  %p944_p8 = scmp.ge.s32.totalorder %s1288_s1, 1 }
  0x31   : > { %s102_s30 = sld [smem:[%s1623_s28 + %s1625_s29]]  ;;  %p117_p9 = scmp.lt.s32.totalorder %s1288_s1, 4 }
  0x32   : > { %s1611_s2 = sld [smem:[#allocation14_spill]]  ;;  %s1450_s17 = scalar_lea.sflag [#allocation6], %s97_s25 }
  0x33   : > { %p1441_p12 = pnand %p944_p8, %p117_p9  ;;  %p1168_p13 = pneg %p1428_p7 }
  0x37   : > { %s972_s13 = sshll.u32 %s102_s30, 10 }
  0x38   : > { %s1448_s16 = scalar_lea.hbm %s1611_s2, %s972_s13  ;;  %s1171_s28 = scalar_lea.hbm %s1611_s2, 2048 }
  0x39   : > { %s1166_s19 = scalar_lea.hbm %s1448_s16, 1024  ;;  %p1172_p2 = scmp.lt.u32.totalorder %s1448_s16, %s1611_s2 }
  0x3a   : > { %p1167_p10 = scmp.ne.s32.totalorder %s1448_s16, %s1166_s19  ;;  %p1173_p4 = scmp.lt.u32.totalorder %s1171_s28, %s1166_s19 }
  0x3b   : > { %p1175_p8 = scmp.lt.u32.totalorder %s1166_s19, %s1448_s16 }
  0x3c   : > { %p1169_p0 = pnand %p1168_p13, %p1167_p10  ;;  %p1174_p5 = por %p1173_p4, %p1172_p2 }
  0x3e   : > { %p1170_p1 = pneg %p1169_p0  ;;  %p1176_p9 = por %p1175_p8, %p1174_p5 }
  0x40   : > { %p1177_p6 = pnand %p1176_p9, %p1170_p1 }
  0x42   : > { %1180 = shalt.err (!%p1177_p6)
}
  0x43   : > { %s1181_s25 = scalar_lea.vmem %s1439_s7, 1024  ;;  %s1292_s4 = smov [#allocation5]  }
  0x44   : > { %p1182_p10 = scmp.ne.s32.totalorder %s1439_s7, %s1181_s25  ;;  %s1186_s13 = sshll.u32 %s1292_s4, 4  ;;  %s1187_s13 = int_to_ptr.vmem [resolvable:$false] %s1186_s13 }
  0x45   : > { %s1188_s14 = scalar_lea.vmem %s1187_s13, 2048  ;;  %p1189_p11 = scmp.lt.s32.totalorder %s1439_s7, %s1187_s13 }
  0x46   : > { %p1184_p0 = pnand %p1182_p10, %p1168_p13  ;;  %p1190_p2 = scmp.lt.s32.totalorder %s1188_s14, %s1181_s25 }
  0x48   : > { %p1185_p3 = pneg %p1184_p0  ;;  %p1191_p4 = por %p1190_p2, %p1189_p11 }
  0x4a   : > { %p1192_p5 = pnand %p1191_p4, %p1185_p3 }
  0x4c   : > { %1195 = shalt.err (!%p1192_p5)
}
  0x4d   : > { %s1293_s15 = smov 128   ;;  %s1294_s19 = smov 8  }
  0x4e   : > { %1073 = dma.hbm_to_vmem [thread:$0]  (!%p1428_p7), %s1448_s16, 1024, %s1439_s7, %s1450_s17, %s1293_s15, %s1293_s15, %s1294_s19  }
  0x4f   : > { %121 = sbr.rel (%p1441_p12) target bundleno = 577 (0x241), region = 24  ;;  %s123_s20 = sand.u32 (!%p1441_p12), 1, %s1280_s8  }
  0x50   : > { %s945_s26 = sshll.u32 (!%p1441_p12), %s123_s20, 6  ;;  %s124_s28 = scalar_lea.sflag (!%p1441_p12), [#allocation6], %s123_s20 }
  0x51   : > { %s1481_s29 = scalar_lea.vmem (!%p1441_p12), [#allocation5], %s945_s26  ;;  %p1612_p11 = scmp.ne.s32.totalorder (!%p1441_p12), %s1606_s18, 0 }
  0x56   : > { %1255 = dma.done.wait (%p1612_p11), %s124_s28, 1024  }
  0x57   : > { %1257 = vsyncadd (%p1612_p11), %s124_s28, 4294966272  ;;  %s147_s30 = sshra.s32 %s1380_s10, 7  ;;  %s152_s27 = sand.u32 127, %s1380_s10  ;;  %v1295_v0 = vmov 0.0|0.0   ;;  %vm1296_vm0 = vmmov 0   ;;  %v1297_v1 = vmov 0.0   ;;  %v177_v8 = vlaneseq }
  0x58   : > { %1050 = vmatprep.subr.bf16.mxu0 %v1295_v0  ;;  %1053 = vmatprep.subr.bf16.mxu1 %v1295_v0  ;;  %s973_s7 = sshll.u32 %s147_s30, 7  ;;  %v259_v2 = vld [vmem:[%s1481_s29] sm:$0xff]  ;;  %v260_v3 = vld [vmem:[%s1481_s29 + $0x8] sm:$0xff]  ;;  %v261_v4 = vld [vmem:[%s1481_s29 + $0x10] sm:$0xff]  ;;  %vm267_vm13 = vcmask 130048   ;;  %vm846_vm14 = vcmask 27648  }
  0x59   : > { %1006 = vmatprep.mubr.msk.f32.mxu0 %vm1296_vm0, %v1297_v1  ;;  %1013 = vmatprep.mubr.msk.f32.mxu1 %vm1296_vm0, %v1297_v1  ;;  %s974_s18 = sadd.s32 128, %s973_s7  ;;  %s976_s11 = sadd.s32 256, %s973_s7  ;;  %v1051_v5 = vpack.c.bf16 %v260_v3, %v259_v2  ;;  %v262_v6 = vld [vmem:[%s1481_s29 + $0x18] sm:$0xff]  ;;  %v181_v9 = vshrl.u32 %v177_v8, 7  ;;  %v178_v18 = vand.u32 127, %v177_v8  ;;  %v263_v53 = vld [vmem:[%s1481_s29 + $0x20] sm:$0xff] }
  0x5a   : > { %s153_s16 = sadd.s32 %s974_s18, %s152_s27  ;;  %s158_s17 = sadd.s32 %s976_s11, %s152_s27  ;;  %v1054_v7 = vpack.c.bf16 %v262_v6, %v261_v4  ;;  %v264_v55 = vld [vmem:[%s1481_s29 + $0x28] sm:$0xff]  ;;  %v265_v56 = vld [vmem:[%s1481_s29 + $0x30] sm:$0xff]  ;;  %v266_v57 = vld [vmem:[%s1481_s29 + $0x38] sm:$0xff] }
  0x5b   : > { %s1493_s25 = sld [smem:[#allocation4 + %s153_s16]]  ;;  %s978_s13 = sadd.s32 384, %s973_s7  ;;  %1052 = vmatpush3.bf16.msra.mxu0 %v1051_v5  ;;  %v182_v10 = vcvt.s32.f32 %v181_v9  ;;  %v179_v27 = vcvt.s32.f32 %v178_v18  ;;  %v1060_v2 = vpack.c.bf16 %v266_v57, %v265_v56 }
  0x5c   : > { %s1495_s4 = sld [smem:[#allocation4 + %s158_s17]]  ;;  %s980_s14 = sadd.s32 512, %s973_s7  ;;  %1055 = vmatpush3.bf16.msra.mxu1 %v1054_v7  ;;  %1056 = vmatprep.subr.bf16.mxu0 %v1295_v0 }
  0x5d   : > { %s163_s15 = sadd.s32 %s978_s13, %s152_s27  ;;  %s168_s19 = sadd.s32 %s980_s14, %s152_s27  ;;  %1059 = vmatprep.subr.bf16.mxu1 %v1295_v0  ;;  %v1057_v0 = vpack.c.bf16 %v264_v55, %v263_v53 }
  0x5e   : > { %s164_s20 = sld [smem:[#allocation4 + %s163_s15]]  ;;  %s1298_s16 = smov 1.0  }
  0x5f   : > { %s169_s26 = sld [smem:[#allocation4 + %s168_s19]]  ;;  %p1613_p6 = scmp.ne.s32.totalorder %s1607_s23, 0 }
  0x61   : > { %s155_s28 = smul.f32 0.5, %s1493_s25 }
  0x62   : > { %s160_s30 = smul.f32 0.5, %s1495_s4 }
  0x63   : > { %v223_v12 = vstv %s155_s28 }
  0x64   : > { %s165_s18 = smul.f32 0.5, %s164_s20  ;;  %v185_v14 = vstv %s160_s30 }
  0x65   : > { %s170_s7 = smul.f32 0.5, %s169_s26 }
  0x66   : > { %s171_s11 = ssub.f32 %s165_s18, %s155_s28  ;;  %s981_s18 = sshll.u32 %s1380_s10, 8 }
  0x67   : > { %s173_s27 = ssub.f32 %s170_s7, %s160_s30 }
  0x68   : > { %s172_s17 = smax.f32 %s1298_s16, %s171_s11 }
  0x69   : > { %s174_s13 = smax.f32 %s1298_s16, %s173_s27  ;;  %s176_s14 = smul.f32 0.25, %s172_s17 }
  0x6a   : > { %s175_s15 = smul.f32 0.25, %s174_s13  ;;  %s1546_s27 = scalar_lea.hbm %s1600_s3, %s981_s18 }
  0x6b   : > { %v221_v11 = vstv %s176_s14  ;;  %s225_s19 = smul.f32 0.5, %s176_s14  ;;  %s1299_s17 = smov [#allocation8]  }
  0x6c   : > { %v183_v13 = vstv %s175_s15  ;;  %s187_s2 = smul.f32 0.5, %s175_s15  ;;  %v222_v15 = vmul.f32 %v221_v11, %v182_v10  ;;  %s1200_s13 = sshll.u32 %s1299_s17, 4  ;;  %s1201_s13 = int_to_ptr.vmem [resolvable:$false] %s1200_s13 }
  0x6d   : > { %v184_v16 = vmul.f32 %v183_v13, %v182_v10  ;;  %s226_s25 = smul.f32 0.5, %s225_s19  ;;  %s1202_s14 = scalar_lea.vmem %s1201_s13, 512 }
  0x6e   : > { %s188_s4 = smul.f32 0.5, %s187_s2  ;;  %v224_v17 = vadd.f32 %v223_v12, %v222_v15 }
  0x6f   : > { %v186_v19 = vadd.f32 %v185_v14, %v184_v16  ;;  %s204_s20 = smul.f32 1.5, %s187_s2  ;;  %v227_v20 = vstv %s226_s25  ;;  %s143_s2 = sand.u32 1, %s1268_s5  }
  0x70   : > { %v189_v21 = vstv %s188_s4  ;;  %v228_v22 = vadd.f32 %v227_v20, %v224_v17  ;;  %s242_s26 = smul.f32 1.5, %s225_s19  ;;  %s946_s29 = sshll.u32 %s143_s2, 4 }
  0x71   : > { %v190_v23 = vadd.f32 %v189_v21, %v186_v19  ;;  %v205_v24 = vstv %s204_s20  ;;  %s145_s28 = scalar_lea.vmem [#allocation8], %s946_s29  ;;  %s1548_s10 = scalar_lea.sflag [#allocation7], %s143_s2 }
  0x72   : > { %v206_v25 = vadd.f32 %v205_v24, %v186_v19  ;;  %v234_v26 = vmax.f32 %v228_v22, 0.0  ;;  %v243_v29 = vstv %s242_s26  ;;  %vm229_vm7 = vcmp.ge.f32.partialorder %v228_v22, -1.0  ;;  %s865_s30 = sshll.u32 %s145_s28, 4  ;;  %s1541_s30 = int_to_ptr.vmem [resolvable:$true] %s865_s30 }
  0x73   : > { %v196_v28 = vmax.f32 %v190_v23, 0.0  ;;  %v244_v33 = vadd.f32 %v243_v29, %v224_v17  ;;  %vm191_vm1 = vcmp.ge.f32.partialorder %v190_v23, -1.0  ;;  %vm192_vm2 = vcmp.le.f32.partialorder %v190_v23, 16.0  ;;  %s1196_s16 = scalar_lea.vmem %s1541_s30, 256  ;;  %p1203_p13 = scmp.lt.s32.totalorder %s1541_s30, %s1201_s13 }
  0x74   : > { %v212_v30 = vmax.f32 %v206_v25, 0.0  ;;  %v235_v32 = vmin.f32 %v234_v26, 15.0  ;;  %vm207_vm3 = vcmp.ge.f32.partialorder %v206_v25, -1.0  ;;  %vm208_vm4 = vcmp.le.f32.partialorder %v206_v25, 16.0  ;;  %vm193_vm5 = vmand %vm191_vm1, %vm192_vm2  ;;  %p1197_p3 = scmp.ne.s32.totalorder %s1541_s30, %s1196_s16  ;;  %p1204_p1 = scmp.lt.s32.totalorder %s1202_s14, %s1196_s16 }
  0x75   : > { %v197_v31 = vmin.f32 %v196_v28, 15.0  ;;  %v250_v38 = vmax.f32 %v244_v33, 0.0  ;;  %vm209_vm6 = vmand %vm207_vm3, %vm208_vm4  ;;  %vm230_vm8 = vcmp.le.f32.partialorder %v228_v22, 16.0  ;;  %vm245_vm9 = vcmp.ge.f32.partialorder %v244_v33, -1.0 }
  0x76   : > { %v213_v34 = vmin.f32 %v212_v30, 15.0  ;;  %v236_v36 = vsub.f32 %v235_v32, %v179_v27  ;;  %vm246_vm10 = vcmp.le.f32.partialorder %v244_v33, 16.0  ;;  %v951_v44 = vsel %vm193_vm5, 1.0, %v1297_v1  ;;  %vm231_vm11 = vmand %vm229_vm7, %vm230_vm8  ;;  %p1198_p7 = pnand %p1197_p3, %p1613_p6  ;;  %p1205_p8 = por %p1204_p1, %p1203_p13 }
  0x77   : > { %v198_v35 = vsub.f32 %v197_v31, %v179_v27  ;;  %v251_v42 = vmin.f32 %v250_v38, 15.0  ;;  %v952_v49 = vsel %vm209_vm6, 1.0, %v1297_v1  ;;  %vm247_vm12 = vmand %vm245_vm9, %vm246_vm10  ;;  %v953_v60 = vsel %vm231_vm11, 1.0, %v1297_v1 }
  0x78   : > { %v214_v37 = vsub.f32 %v213_v34, %v179_v27  ;;  %v237_v40 = vand.u32 2147483647, %v236_v36  ;;  %v954_v61 = vsel %vm247_vm12, 1.0, %v1297_v1  ;;  %p1199_p12 = pneg %p1198_p7 }
  0x79   : > { %v199_v39 = vand.u32 2147483647, %v198_v35  ;;  %v252_v47 = vsub.f32 %v251_v42, %v179_v27 }
  0x7a   : > { %v215_v41 = vand.u32 2147483647, %v214_v37  ;;  %v238_v46 = vsub.f32 1.0, %v237_v40  ;;  %p1206_p9 = pnand %p1205_p8, %p1199_p12 }
  0x7b   : > { %v200_v43 = vsub.f32 1.0, %v199_v39  ;;  %v253_v51 = vand.u32 2147483647, %v252_v47 }
  0x7c   : > { %v216_v45 = vsub.f32 1.0, %v215_v41  ;;  %v239_v58 = vmax.f32 %v238_v46, 0.0 }
  0x7d   : > { %v201_v48 = vmax.f32 %v200_v43, 0.0  ;;  %v254_v59 = vsub.f32 1.0, %v253_v51 }
  0x7e   : > { %v217_v50 = vmax.f32 %v216_v45, 0.0  ;;  %v240_v4 = vmul.f32 %v953_v60, %v239_v58 }
  0x7f   : > { %v202_v52 = vmul.f32 %v951_v44, %v201_v48  ;;  %v255_v63 = vmax.f32 %v254_v59, 0.0 }
  0x80   : > { %v218_v54 = vmul.f32 %v952_v49, %v217_v50 }
  0x81   : > { %v256_v5 = vmul.f32 %v954_v61, %v255_v63 }
  0x82   : > { %v219_v62 = vadd.f32 %v218_v54, %v202_v52 }
  0x83   : > { %v257_v6 = vadd.f32 %v256_v5, %v240_v4 }
  0x84   : > { %v220_v3 = vmul.f32 0.5, %v219_v62 }
  0x85   : > { %v258_v7 = vmul.f32 0.5, %v257_v6 }
  0x86   : > { %1007 = vmatmul.mubr.msk.f32.vlgmr.msra.gmra.mrb[0].mxu0 %vm267_vm13, %v220_v3  ;;  %1014 = vmatmul.mubr.msk.f32.vlgmr.msra.gmra.mrb[0].mxu1 %vm267_vm13, %v220_v3 }
  0x87   : > { %1058 = vmatpush3.bf16.msra.mxu0 %v1057_v0  ;;  %1061 = vmatpush3.bf16.msra.mxu1 %v1060_v2 }
  0x88   : > { %1020 = vmatprep.mubr.msk.f32.mxu0 %vm1296_vm0, %v1297_v1  ;;  %1027 = vmatprep.mubr.msk.f32.mxu1 %vm1296_vm0, %v1297_v1 }
  0x89   : > { %1030 = vmatprep.subr.mxu0 %v1297_v1  ;;  %1035 = vmatprep.subr.mxu1 %v1297_v1 }
  0x8a   : > { %1021 = vmatmul.mubr.msk.f32.vlgmr.msra.gmra.mrb[2].mxu0 %vm267_vm13, %v220_v3  ;;  %1028 = vmatmul.mubr.msk.f32.vlgmr.msra.gmra.mrb[2].mxu1 %vm267_vm13, %v220_v3 }
  0x8b   : > { %1032 = vmatprep.mubr.msk.f32.mxu0 %vm1296_vm0, %v1297_v1  ;;  %1037 = vmatprep.mubr.msk.f32.mxu1 %vm1296_vm0, %v1297_v1 }
  0x90   : > { %1031 = vmatpush3.xpose.msk.msra.mxu0 %vm267_vm13, %v258_v7  ;;  %1036 = vmatpush3.xpose.msk.msra.mxu1 %vm267_vm13, %v258_v7 }
  0x91   : > { %1040 = vmatprep.subr.mxu0 %v1297_v1  ;;  %1045 = vmatprep.subr.mxu1 %v1297_v1 }
 0x159   : > { %v337_v8 = vpop.f32.mrb[0].mxu0  ;;  %v407_v9 = vpop.f32.mrb[0].mxu1 }
 0x15a   : > { %v1008_v10 = vpop.f32.mrb[1].mxu0  ;;  %v1015_v11 = vpop.f32.mrb[1].mxu1  ;;  %1033 = vmatmul.mubr.msk.f32.vlgmr.msra.gmra.mrb[4].mxu0 %vm267_vm13, %v337_v8  ;;  %1038 = vmatmul.mubr.msk.f32.vlgmr.msra.gmra.mrb[4].mxu1 %vm267_vm13, %v407_v9 }
 0x15b   : > { %1041 = vmatpush3.xpose.msk.msra.mxu0 %vm267_vm13, %v258_v7  ;;  %1046 = vmatpush3.xpose.msk.msra.mxu1 %vm267_vm13, %v258_v7 }
 0x15c   : > { %1042 = vmatprep.mubr.msk.f32.mxu0 %vm1296_vm0, %v1297_v1  ;;  %1047 = vmatprep.mubr.msk.f32.mxu1 %vm1296_vm0, %v1297_v1 }
 0x15d   : > { %v477_v12 = vpop.f32.mrb[2].mxu0  ;;  %v547_v13 = vpop.f32.mrb[2].mxu1 }
 0x15e   : > { %v1022_v14 = vpop.f32.mrb[3].mxu0  ;;  %v1029_v15 = vpop.f32.mrb[3].mxu1  ;;  %1043 = vmatmul.mubr.msk.f32.vlgmr.msra.gmra.mrb[6].mxu0 %vm267_vm13, %v477_v12  ;;  %1048 = vmatmul.mubr.msk.f32.vlgmr.msra.gmra.mrb[6].mxu1 %vm267_vm13, %v547_v13 }
 0x22d   : > { %v623_v16 = vpop.f32.mrb[4].mxu0  ;;  %v696_v17 = vpop.f32.mrb[4].mxu1 }
 0x22e   : > { %847 = vst.msk [vmem:[%s145_s28] sm:$0xf] %vm846_vm14, %v623_v16  ;;  %848 = vst.msk [vmem:[%s145_s28 + $0x4] sm:$0xf] %vm846_vm14, %v696_v17  ;;  %v1034_v1 = vpop.f32.mrb[5].mxu0  ;;  %v1039_v18 = vpop.f32.mrb[5].mxu1 }
 0x231   : > { %v769_v19 = vpop.f32.mrb[6].mxu0  ;;  %v842_v20 = vpop.f32.mrb[6].mxu1 }
 0x232   : > { %849 = vst.msk [vmem:[%s145_s28 + $0x8] sm:$0xf] %vm846_vm14, %v769_v19  ;;  %850 = vst.msk [vmem:[%s145_s28 + $0xc] sm:$0xf] %vm846_vm14, %v842_v20  ;;  %v1044_v21 = vpop.f32.mrb[7].mxu0  ;;  %v1049_v22 = vpop.f32.mrb[7].mxu1 }
 0x233   : > { %1209 = shalt.err (!%p1206_p9)
}
 0x234   : > { %s1210_s15 = scalar_lea.hbm %s1546_s27, 256  ;;  %s1214_s4 = scalar_lea.hbm %s1600_s3, 768 }
 0x235   : > { %p1211_p10 = scmp.ne.s32.totalorder %s1546_s27, %s1210_s15  ;;  %p1215_p4 = scmp.lt.u32.totalorder %s1546_s27, %s1600_s3 }
 0x236   : > { %p1216_p5 = scmp.lt.u32.totalorder %s1214_s4, %s1210_s15  ;;  %p1218_p3 = scmp.lt.u32.totalorder %s1210_s15, %s1546_s27 }
 0x237   : > { %p1212_p0 = pnand %p1211_p10, %p1613_p6 }
 0x238   : > { %p1217_p11 = por %p1216_p5, %p1215_p4 }
 0x239   : > { %p1213_p2 = pneg %p1212_p0 }
 0x23a   : > { %p1219_p7 = por %p1218_p3, %p1217_p11 }
 0x23c   : > { %p1220_p12 = pnand %p1219_p7, %p1213_p2 }
 0x23e   : > { %1223 = shalt.err (!%p1220_p12)
}
 0x23f   : > { %s1300_s2 = smov 64   ;;  %s1301_s29 = smov 4  }
 0x240   : > { %1066 = dma.vmem_to_hbm [thread:$0]  (%p1613_p6), %s1541_s30, 256, %s1546_s27, %s1548_s10, %s1300_s2, %s1300_s2, %s1301_s29  }
 0x241 PF: > { %p1079_p13 = scmp.ge.s32.totalorder %s1288_s1, 2  ;;  %s880_s28 = sand.u32 1, %s1264_s0  }
 0x242   : > { %p1614_p1 = scmp.ne.s32.totalorder %s1608_s24, 0  ;;  %s881_s18 = scalar_lea.sflag [#allocation7], %s880_s28 }
 0x244   : > { %p1075_p8 = pnand %p1079_p13, %p1614_p1 }
 0x246   : > { %1259 = dma.done.wait (!%p1075_p8), %s881_s18, 256  }
 0x247   : > { %1261 = vsyncadd (!%p1075_p8), %s881_s18, 4294967040  ;;  %p22_p6 = scmp.ge.s32.totalorder %s1384_s12, 5   ;;  %s1615_s0 = smov %s1268_s5 }
 0x248   : > { %s1616_s5 = smov %s1272_s6  ;;  %s1617_s6 = smov %s1411_s21 }
 0x249   : > { %s1618_s7 = smov %s1280_s8  ;;  %s1619_s8 = smov %s1284_s9 }
 0x24a   : > { %s1620_s9 = smov %s1414_s22  ;;  %s1621_s1 = smov %s1384_s12 }
 0x24b   :  { %24 = sbr.rel (!%p22_p6) target bundleno = 26 (0x1a), region = 69 }
 0x252   :  { %886 = vsyncpa [#allocation6], 1 }
 0x253   :  { %888 = vsyncpa [#allocation6 + $0x1], 1 }
 0x254   :  { %889 = vsyncpa [#allocation7], 1 }
 0x255   :  { %891 = vsyncpa [#allocation7 + $0x1], 1 }

</bundles_post_ra>
